<compile_context>
chip_gen: v7x
topology: tpu7x:2x2x1
jax: 0.10.0
libtpu: 0.0.40
codegen_flags: <defaults>
</compile_context>

<pallas_src>
import math
from functools import partial

import jax
import jax.numpy as jnp
from jax.experimental import pallas as pl
from jax.experimental.pallas import tpu as pltpu

_INV_SQRT2 = 1.0 / math.sqrt(2.0)
_TANH_C = math.sqrt(2.0 / math.pi)


def _gelu(h, approximate):
    if approximate:
        # torch GELU(approximate='tanh'); tanh runs on the EUP slot.
        return 0.5 * h * (1.0 + jnp.tanh(_TANH_C * (h + 0.044715 * (h * h * h))))
    # exact erf GELU (torch nn.GELU default) -- VALU polynomial, parity mode.
    return 0.5 * h * (1.0 + jax.lax.erf(h * _INV_SQRT2))


def _mlp_kernel(x_ref, w1_ref, b1_ref, w2_ref, b2_ref, o_ref, *scratch,
                compute_dtype, gelu_approx):
    # x_ref:  (TM, D_in)      token tile (constant over n, k)
    # w1_ref: (D_in, TH)      fc1 weight chunk
    # b1_ref: (1, TH)         fc1 bias chunk
    # w2_ref: (TH, TN)        fc2 weight chunk
    # b2_ref: (1, TN)         fc2 bias chunk
    # o_ref:  (TM, TN)        output tile (block index constant over k)
    # scratch: optional f32 accumulator (only when output dtype != f32)
    acc_ref = scratch[0] if scratch else o_ref
    k = pl.program_id(2)

    @pl.when(k == 0)
    def _init():
        acc_ref[...] = jnp.zeros_like(acc_ref)

    x = x_ref[...].astype(compute_dtype)
    w1 = w1_ref[...].astype(compute_dtype)

    # fc1 partial (this hidden chunk) with f32 accumulation, bias + GELU in f32
    h = jnp.dot(x, w1, preferred_element_type=jnp.float32)
    h += b1_ref[...].astype(jnp.float32)
    h = _gelu(h, gelu_approx)

    # dropout(p=0.0) is the identity -> nothing to do.

    # fc2 partial product accumulated in f32 in the resident block.
    acc_ref[...] += jnp.dot(h.astype(compute_dtype),
                            w2_ref[...].astype(compute_dtype),
                            preferred_element_type=jnp.float32)

    @pl.when(k == pl.num_programs(2) - 1)
    def _finalize():
        o_ref[...] = (acc_ref[...] + b2_ref[...].astype(jnp.float32)
                      ).astype(o_ref.dtype)


def _round_up(v, m):
    return (v + m - 1) // m * m


def _vmem_capacity_bytes():
    """Physical VMEM of the current chip (128 MiB v5e/v6e, 64 MiB v7x)."""
    try:
        info = pltpu.get_tpu_info()
        for attr in ("vmem_capacity_bytes", "vmem_size_bytes", "vmem_bytes"):
            cap = getattr(info, attr, None)
            if cap:
                return int(cap)
    except Exception:
        pass
    return 64 << 20   # conservative fallback (v7x-sized)


def _vmem_bytes(tm, th, tn, d_in, in_sz, w_sz, out_sz, use_acc, w_bufs):
    est = 2 * tm * d_in * in_sz                        # x tile (double-buffered)
    est += w_bufs * d_in * th * w_sz                   # fc1 weight chunk
    est += w_bufs * th * tn * w_sz                     # fc2 weight chunk
    est += 2 * 8 * th * w_sz + 2 * 8 * tn * w_sz       # biases (sublane-padded)
    est += 2 * tm * tn * out_sz                        # output tile
    if use_acc:
        est += 4 * tm * tn                             # f32 accumulator scratch
    # in-kernel temporaries: f32 GELU intermediate, its compute-dtype copy,
    # and operand cast copies.
    est += tm * th * (4 + 2) + 2 * (tm * d_in + d_in * th + th * tn)
    return est


def _dedupe(seq):
    seen, out = set(), []
    for c in seq:
        if c not in seen:
            seen.add(c)
            out.append(c)
    return out


def _m_candidates(M):
    m_full = _round_up(max(M, 1), 16)
    cands = {min(512, m_full)}
    cands.update(m for m in (512, 256, 128, 64, 32, 16) if m <= m_full)
    return sorted(cands, reverse=True)


def _h_candidates(d_hid, cap=2048):
    top = min(d_hid, cap)
    cands = [c for c in range((top // 128) * 128, 127, -128) if d_hid % c == 0]
    if d_hid <= cap:
        cands = [d_hid] + cands
    if not cands:
        cands = [d_hid]
    return _dedupe(cands)


def _n_candidates(d_out):
    cands = [d_out]
    start = ((d_out - 1) // 128) * 128
    cands += [c for c in range(start, 127, -128) if d_out % c == 0]
    return _dedupe(cands)


def _select_tiles(M, d_in, d_hid, d_out, in_sz, w_sz, out_sz, use_acc, budget):
    """Pick (tile_m, tile_h, tile_n) to fill the VMEM budget.

    Priority: keep tile_m large (controls weight HBM re-streaming), then keep
    d_out untiled, shrinking hidden chunks first, then tile_n, then tile_m.
    """
    m_cands = _m_candidates(M)
    h_cands = _h_candidates(d_hid)
    n_cands = _n_candidates(d_out)
    for tm in m_cands:
        for tn in n_cands:
            for th in h_cands:
                if _vmem_bytes(tm, th, tn, d_in, in_sz, w_sz, out_sz,
                               use_acc, 2) <= budget:
                    return tm, th, tn
    return m_cands[-1], h_cands[-1], n_cands[-1]


def mlp_pallas(x, w1, b1, w2, b2, *, precision="bf16", gelu_approx=True,
               tile_m=None, tile_h=None, tile_n=None, weight_buffers=None):
    """x: [B, N, D_in] -> [B, N, D_out].  Weights stored (in, out) == torch weight.T.

    precision:   "bf16" (default) -> bf16 MXU operands, f32 accumulation (fast)
                 "f32"            -> strict f32 parity with the torch module
    gelu_approx: True (default)   -> tanh-approx GELU (EUP slot)
                 False            -> exact erf GELU (torch nn.GELU default)
    """
    B, N, d_in = x.shape
    d_hid = w1.shape[1]
    d_out = w2.shape[1]
    M = B * N

    in_sz = jnp.dtype(x.dtype).itemsize
    w_sz = jnp.dtype(w1.dtype).itemsize
    out_sz = in_sz
    compute_dtype = jnp.bfloat16 if precision == "bf16" else x.dtype

    # f32 outputs accumulate directly in the resident output block; other
    # output dtypes need a separate f32 VMEM accumulator.
    use_acc_scratch = jnp.dtype(x.dtype) != jnp.dtype(jnp.float32)

    # Chip-aware tiling: target ~3/4 of physical VMEM (~96 MiB v5e/v6e, ~48 MiB v7x).
    vmem_cap = _vmem_capacity_bytes()
    budget = (vmem_cap * 3) // 4

    a_tm, a_th, a_tn = _select_tiles(M, d_in, d_hid, d_out, in_sz, w_sz,
                                     out_sz, use_acc_scratch, budget)
    tile_m = a_tm if tile_m is None else min(tile_m, _round_up(M, 16))
    tile_h = a_th if tile_h is None else tile_h
    tile_n = a_tn if tile_n is None else tile_n
    assert d_hid % tile_h == 0, "tile_h must divide hidden_features"
    assert d_out % tile_n == 0, "tile_n must divide out_features"

    M_pad = _round_up(M, tile_m)
    n_i, n_n, n_k = M_pad // tile_m, d_out // tile_n, d_hid // tile_h

    # Triple-buffer the streamed weight chunks when the reduction is long and
    # the extra chunk fits (hides chunk DMA behind short k-steps).
    if weight_buffers is None:
        weight_buffers = 2
        if n_k >= 4 and _vmem_bytes(tile_m, tile_h, tile_n, d_in, in_sz, w_sz,
                                    out_sz, use_acc_scratch, 3) <= budget:
            weight_buffers = 3
    w_spec_kwargs = ({"pipeline_mode": pl.Buffered(weight_buffers)}
                     if weight_buffers > 2 else {})

    x2d = x.reshape(M, d_in)
    if M_pad != M:
        x2d = jnp.pad(x2d, ((0, M_pad - M), (0, 0)))
    b1_2d = b1.reshape(1, d_hid)
    b2_2d = b2.reshape(1, d_out)

    vmem_est = _vmem_bytes(tile_m, tile_h, tile_n, d_in, in_sz, w_sz, out_sz,
                           use_acc_scratch, weight_buffers)
    vmem_limit = int(min(vmem_cap - (4 << 20),
                         max(vmem_est + (8 << 20), 32 << 20)))

    cost = pl.CostEstimate(
        flops=2 * M_pad * d_in * d_hid * n_n + 2 * M_pad * d_hid * d_out,
        transcendentals=M_pad * d_hid * n_n,
        bytes_accessed=(in_sz * M_pad * d_in                      # x read once per i tile
                        + out_sz * M_pad * d_out                  # output written
                        + w_sz * n_i * n_n * (d_in * d_hid + d_hid)   # w1+b1 per (i, n)
                        + w_sz * n_i * (d_hid * d_out + d_out)),      # w2+b2 per i
    )

    kernel = partial(_mlp_kernel, compute_dtype=compute_dtype,
                     gelu_approx=gelu_approx)

    scratch_shapes = ([pltpu.VMEM((tile_m, tile_n), jnp.float32)]
                      if use_acc_scratch else [])

    out2d = pl.pallas_call(
        kernel,
        out_shape=jax.ShapeDtypeStruct((M_pad, d_out), x.dtype),
        grid_spec=pltpu.PrefetchScalarGridSpec(
            num_scalar_prefetch=0,
            grid=(n_i, n_n, n_k),                                    # reduction last
            in_specs=[
                pl.BlockSpec((tile_m, d_in), lambda i, n, k: (i, 0)),      # x tile
                pl.BlockSpec((d_in, tile_h), lambda i, n, k: (0, k),
                             **w_spec_kwargs),                             # w1 chunk
                pl.BlockSpec((1, tile_h), lambda i, n, k: (0, k)),         # b1 chunk
                pl.BlockSpec((tile_h, tile_n), lambda i, n, k: (k, n),
                             **w_spec_kwargs),                             # w2 chunk
                pl.BlockSpec((1, tile_n), lambda i, n, k: (0, n)),         # b2 chunk
            ],
            out_specs=pl.BlockSpec((tile_m, tile_n), lambda i, n, k: (i, n)),
            scratch_shapes=scratch_shapes,
        ),
        compiler_params=pltpu.CompilerParams(
            dimension_semantics=("parallel", "parallel", "arbitrary"),
            vmem_limit_bytes=vmem_limit,
        ),
        cost_estimate=cost,
    )(x2d, w1, b1_2d, w2, b2_2d)

    if M_pad != M:
        out2d = out2d[:M]
    return out2d.reshape(B, N, d_out)


def init_mlp_params(key, in_features, hidden_features, out_features,
                    dtype=jnp.float32):
    """Deterministic init mirroring nn.Linear's uniform(-1/sqrt(fan_in), ...)."""
    k1, k2, k3, k4 = jax.random.split(key, 4)
    lim1 = 1.0 / math.sqrt(in_features)
    lim2 = 1.0 / math.sqrt(hidden_features)
    # stored as (in, out) == torch weight.T
    w1 = jax.random.uniform(k1, (in_features, hidden_features), dtype,
                            minval=-lim1, maxval=lim1)
    b1 = jax.random.uniform(k2, (hidden_features,), dtype,
                            minval=-lim1, maxval=lim1)
    w2 = jax.random.uniform(k3, (hidden_features, out_features), dtype,
                            minval=-lim2, maxval=lim2)
    b2 = jax.random.uniform(k4, (out_features,), dtype,
                            minval=-lim2, maxval=lim2)
    return w1, b1, w2, b2


def mlp_reference(x, w1, b1, w2, b2, gelu_approx=True):
    """Plain-JAX reference for correctness checking."""
    h = x @ w1 + b1
    h = _gelu(h, gelu_approx)
    return h @ w2 + b2


if __name__ == "__main__":
    key = jax.random.PRNGKey(0)
    kx, kp, kx2 = jax.random.split(key, 3)

    # small shapes: batch=2, seq=8, in_features=32, hidden=64, out=32
    B, N = 2, 8
    in_features, hidden_features, out_features = 32, 64, 32

    x = jax.random.normal(kx, (B, N, in_features), dtype=jnp.float32)
    w1, b1, w2, b2 = init_mlp_params(kp, in_features, hidden_features,
                                     out_features)

    # Default fast path: bf16 MXU operands + tanh-approx GELU, f32 accumulation.
    y = jax.block_until_ready(mlp_pallas(x, w1, b1, w2, b2))
    y_ref = mlp_reference(x, w1, b1, w2, b2, gelu_approx=True)
    assert y.shape == (B, N, out_features)
    assert jnp.allclose(y, y_ref, atol=3e-2, rtol=3e-2), "bf16 fast path mismatch"

    # Strict torch-parity path: f32 MXU operands + exact erf GELU.
    y_exact = jax.block_until_ready(
        mlp_pallas(x, w1, b1, w2, b2, precision="f32", gelu_approx=False))
    y_exact_ref = mlp_reference(x, w1, b1, w2, b2, gelu_approx=False)
    assert jnp.allclose(y_exact, y_exact_ref, atol=1e-5, rtol=1e-5), \
        "f32 parity mismatch"

    # Ragged token count (pad-then-slice path), default fast path.
    x2 = jax.random.normal(kx2, (2, 7, in_features), dtype=jnp.float32)
    y2 = jax.block_until_ready(mlp_pallas(x2, w1, b1, w2, b2))
    y2_ref = mlp_reference(x2, w1, b1, w2, b2, gelu_approx=True)
    assert y2.shape == (2, 7, out_features)
    assert jnp.allclose(y2, y2_ref, atol=3e-2, rtol=3e-2), "ragged mismatch"

    print("KERNEL_OK")
</pallas_src>

<mosaic_0001>
module attributes {stable_mosaic.version = 11 : i64} {
  func.func @_mlp_kernel(%arg0: i32, %arg1: i32, %arg2: i32, %arg3: memref<16x32xf32, #tpu.memory_space<vmem>>, %arg4: memref<32x64xf32, #tpu.memory_space<vmem>>, %arg5: memref<1x64xf32, #tpu.memory_space<vmem>>, %arg6: memref<64x32xf32, #tpu.memory_space<vmem>>, %arg7: memref<1x32xf32, #tpu.memory_space<vmem>>, %arg8: memref<16x32xf32, #tpu.memory_space<vmem>>) attributes {dimension_semantics = [#tpu.dimension_semantics<parallel>, #tpu.dimension_semantics<parallel>, #tpu.dimension_semantics<arbitrary>], iteration_bounds = array<i64: 1, 1, 1>, scalar_prefetch = 0 : i64, scratch_operands = 0 : i64, tpu.core_type = #tpu.core_type<tc>, window_params = [{transform_indices = @transform_0, window_bounds = array<i64: 16, 32>}, {transform_indices = @transform_1, window_bounds = array<i64: 32, 64>}, {transform_indices = @transform_2, window_bounds = array<i64: 1, 64>}, {transform_indices = @transform_3, window_bounds = array<i64: 64, 32>}, {transform_indices = @transform_4, window_bounds = array<i64: 1, 32>}, {transform_indices = @transform_5, window_bounds = array<i64: 16, 32>}]} {
    %c0_i32 = arith.constant 0 : i32
    %0 = arith.cmpi eq, %arg2, %c0_i32 : i32
    %1 = arith.extui %0 : i1 to i32
    %c0_i32_0 = arith.constant 0 : i32
    %2 = arith.cmpi ne, %1, %c0_i32_0 : i32
    scf.if %2 {
      %cst_19 = arith.constant 0.000000e+00 : f32
      %34 = vector.broadcast %cst_19 : f32 to vector<16x32xf32>
      %c0_20 = arith.constant 0 : index
      %c0_21 = arith.constant 0 : index
      %35 = vector.load %arg8[%c0_20, %c0_21] : memref<16x32xf32, #tpu.memory_space<vmem>>, vector<16x32xf32>
      tpu.vector_store %arg8[%c0_20, %c0_21], %34 {strides = array<i32>} : memref<16x32xf32, #tpu.memory_space<vmem>>, vector<16x32xf32>,
    } else {
    }
    %c0 = arith.constant 0 : index
    %c0_1 = arith.constant 0 : index
    %3 = vector.load %arg3[%c0, %c0_1] : memref<16x32xf32, #tpu.memory_space<vmem>>, vector<16x32xf32>
    %4 = arith.truncf %3 : vector<16x32xf32> to vector<16x32xbf16>
    %c0_2 = arith.constant 0 : index
    %c0_3 = arith.constant 0 : index
    %5 = vector.load %arg4[%c0_2, %c0_3] : memref<32x64xf32, #tpu.memory_space<vmem>>, vector<32x64xf32>
    %6 = arith.truncf %5 : vector<32x64xf32> to vector<32x64xbf16>
    %cst = arith.constant dense<0.000000e+00> : vector<16x64xf32>
    %7 = tpu.matmul %4, %6, %cst {dimension_numbers = #tpu.dot_dimension_numbers<[1], [0], [0], [1], [0, 0, 1, 1], [], []>} : vector<16x32xbf16>, vector<32x64xbf16>, vector<16x64xf32> -> vector<16x64xf32>
    %c0_4 = arith.constant 0 : index
    %c0_5 = arith.constant 0 : index
    %8 = vector.load %arg5[%c0_4, %c0_5] : memref<1x64xf32, #tpu.memory_space<vmem>>, vector<1x64xf32>
    %9 = vector.broadcast %8 : vector<1x64xf32> to vector<16x64xf32>
    %10 = arith.addf %7, %9 : vector<16x64xf32>
    %cst_6 = arith.constant 5.000000e-01 : f32
    %11 = vector.broadcast %cst_6 : f32 to vector<16x64xf32>
    %12 = arith.mulf %11, %10 : vector<16x64xf32>
    %13 = arith.mulf %10, %10 : vector<16x64xf32>
    %14 = arith.mulf %13, %10 : vector<16x64xf32>
    %cst_7 = arith.constant 4.471500e-02 : f32
    %15 = vector.broadcast %cst_7 : f32 to vector<16x64xf32>
    %16 = arith.mulf %15, %14 : vector<16x64xf32>
    %17 = arith.addf %10, %16 : vector<16x64xf32>
    %cst_8 = arith.constant 0.797884583 : f32
    %18 = vector.broadcast %cst_8 : f32 to vector<16x64xf32>
    %19 = arith.mulf %18, %17 : vector<16x64xf32>
    %20 = math.tanh %19 : vector<16x64xf32>
    %cst_9 = arith.constant 1.000000e+00 : f32
    %21 = vector.broadcast %cst_9 : f32 to vector<16x64xf32>
    %22 = arith.addf %21, %20 : vector<16x64xf32>
    %23 = arith.mulf %12, %22 : vector<16x64xf32>
    %c0_10 = arith.constant 0 : index
    %c0_11 = arith.constant 0 : index
    %24 = vector.load %arg8[%c0_10, %c0_11] : memref<16x32xf32, #tpu.memory_space<vmem>>, vector<16x32xf32>
    %25 = arith.truncf %23 : vector<16x64xf32> to vector<16x64xbf16>
    %c0_12 = arith.constant 0 : index
    %c0_13 = arith.constant 0 : index
    %26 = vector.load %arg6[%c0_12, %c0_13] : memref<64x32xf32, #tpu.memory_space<vmem>>, vector<64x32xf32>
    %27 = arith.truncf %26 : vector<64x32xf32> to vector<64x32xbf16>
    %cst_14 = arith.constant dense<0.000000e+00> : vector<16x32xf32>
    %28 = tpu.matmul %25, %27, %cst_14 {dimension_numbers = #tpu.dot_dimension_numbers<[1], [0], [0], [1], [0, 0, 1, 1], [], []>} : vector<16x64xbf16>, vector<64x32xbf16>, vector<16x32xf32> -> vector<16x32xf32>
    %29 = arith.addf %24, %28 : vector<16x32xf32>
    %c0_15 = arith.constant 0 : index
    %c0_16 = arith.constant 0 : index
    %30 = vector.load %arg8[%c0_15, %c0_16] : memref<16x32xf32, #tpu.memory_space<vmem>>, vector<16x32xf32>
    tpu.vector_store %arg8[%c0_15, %c0_16], %29 {strides = array<i32>} : memref<16x32xf32, #tpu.memory_space<vmem>>, vector<16x32xf32>,
    %c0_i32_17 = arith.constant 0 : i32
    %31 = arith.cmpi eq, %arg2, %c0_i32_17 : i32
    %32 = arith.extui %31 : i1 to i32
    %c0_i32_18 = arith.constant 0 : i32
    %33 = arith.cmpi ne, %32, %c0_i32_18 : i32
    scf.if %33 {
      %c0_19 = arith.constant 0 : index
      %c0_20 = arith.constant 0 : index
      %34 = vector.load %arg8[%c0_19, %c0_20] : memref<16x32xf32, #tpu.memory_space<vmem>>, vector<16x32xf32>
      %c0_21 = arith.constant 0 : index
      %c0_22 = arith.constant 0 : index
      %35 = vector.load %arg7[%c0_21, %c0_22] : memref<1x32xf32, #tpu.memory_space<vmem>>, vector<1x32xf32>
      %36 = vector.broadcast %35 : vector<1x32xf32> to vector<16x32xf32>
      %37 = arith.addf %34, %36 : vector<16x32xf32>
      %c0_23 = arith.constant 0 : index
      %c0_24 = arith.constant 0 : index
      %38 = vector.load %arg8[%c0_23, %c0_24] : memref<16x32xf32, #tpu.memory_space<vmem>>, vector<16x32xf32>
      tpu.vector_store %arg8[%c0_23, %c0_24], %37 {strides = array<i32>} : memref<16x32xf32, #tpu.memory_space<vmem>>, vector<16x32xf32>,
    } else {
    }
    return
  }
  func.func @transform_0(%arg0: i32, %arg1: i32, %arg2: i32) -> (i32, i32) {
    %c0_i32 = arith.constant 0 : i32
    %c0_i32_0 = arith.constant 0 : i32
    return %arg0, %c0_i32 : i32, i32
  }
  func.func @transform_1(%arg0: i32, %arg1: i32, %arg2: i32) -> (i32, i32) {
    %c0_i32 = arith.constant 0 : i32
    %c0_i32_0 = arith.constant 0 : i32
    return %c0_i32, %arg2 : i32, i32
  }
  func.func @transform_2(%arg0: i32, %arg1: i32, %arg2: i32) -> (i32, i32) {
    %c0_i32 = arith.constant 0 : i32
    %c0_i32_0 = arith.constant 0 : i32
    return %c0_i32, %arg2 : i32, i32
  }
  func.func @transform_3(%arg0: i32, %arg1: i32, %arg2: i32) -> (i32, i32) {
    %c0_i32 = arith.constant 0 : i32
    return %arg2, %arg1 : i32, i32
  }
  func.func @transform_4(%arg0: i32, %arg1: i32, %arg2: i32) -> (i32, i32) {
    %c0_i32 = arith.constant 0 : i32
    %c0_i32_0 = arith.constant 0 : i32
    return %c0_i32, %arg1 : i32, i32
  }
  func.func @transform_5(%arg0: i32, %arg1: i32, %arg2: i32) -> (i32, i32) {
    %c0_i32 = arith.constant 0 : i32
    return %arg0, %arg1 : i32, i32
  }
}

</mosaic_0001>

<bundles_post_ra>
// kernel: tpu_custom_call.1
= control target key start
LH: loop header
LB: loop body
LE: loop exit
PB: predicated region body
PF: predicated region fallthrough
CT: control target
= control target key end

     0   :  { %vm26_vm0 = vcmask 261120   ;;  %v269_v3 = vmov 0.0   ;;  %vm270_vm1 = vmmov 0   ;;  %s371_s0 = inlined_call_operand.vmem [shape: f32[16,32], index: 0, kind: input, shape index: {}]   ;;  %s372_s1 = inlined_call_operand.vmem [shape: f32[32,64], index: 1, kind: input, shape index: {}]   ;;  %s373_s2 = inlined_call_operand.vmem [shape: f32[1,64], index: 2, kind: input, shape index: {}]   ;;  %s374_s3 = inlined_call_operand.vmem [shape: f32[64,32], index: 3, kind: input, shape index: {}]   ;;  %s375_s4 = inlined_call_operand.vmem [shape: f32[1,32], index: 4, kind: input, shape index: {}]   ;;  %s376_s5 = inlined_call_operand.hbm [shape: f32[16,32], index: 5, kind: output, shape index: {}]  }
   0x1   :  { %v32_v0 = vld [vmem:[%s372_s1] sm:$0xff]  ;;  %v33_v1 = vld [vmem:[%s372_s1 + $0x8] sm:$0xff]  ;;  %v34_v2 = vld [vmem:[%s372_s1 + $0x10] sm:$0xff]  ;;  %216 = vmatprep.subr.bf16.mxu0 %v269_v3  ;;  %220 = vmatprep.mubr.msk.bf16.mxu0 %vm270_vm1, %v269_v3  ;;  %27 = vst.msk [vmem:[#allocation2] sm:$0xff] %vm26_vm0, %v269_v3 }
   0x2   :  { %v36_v4 = vpack.c.bf16 %v33_v1, %v32_v0  ;;  %v35_v5 = vld [vmem:[%s372_s1 + $0x18] sm:$0xff]  ;;  %28 = vst.msk [vmem:[#allocation2 + $0x8] sm:$0xff] %vm26_vm0, %v269_v3  ;;  %224 = vmatprep.subr.bf16.mxu1 %v269_v3  ;;  %232 = vmatprep.mubr.msk.bf16.mxu1 %vm270_vm1, %v269_v3 }
   0x3   :  { %10 = vsyncpa [#allocation3], 0  ;;  %v37_v6 = vpack.c.bf16 %v35_v5, %v34_v2  ;;  %v29_v7 = vld [vmem:[%s371_s0] sm:$0xff]  ;;  %v30_v8 = vld [vmem:[%s371_s0 + $0x8] sm:$0xff]  ;;  %vm123_vm2 = vcmask 523264   ;;  %s271_s21 = smov [#allocation2]  }
   0x4   :  { %217 = vmatpush3.bf16.msra.mxu0 %v36_v4  ;;  %v31_v9 = vpack.c.bf16 %v30_v8, %v29_v7  ;;  %v111_v10 = vld [vmem:[%s374_s3] sm:$0xff]  ;;  %v112_v11 = vld [vmem:[%s374_s3 + $0x8] sm:$0xff]  ;;  %v113_v13 = vld [vmem:[%s374_s3 + $0x10] sm:$0xff]  ;;  %s193_s22 = sshll.u32 %s271_s21, 4  ;;  %s194_s22 = int_to_ptr.vmem [resolvable:$true] %s193_s22 }
   0x5   :  { %218 = vmatprep.subr.bf16.mxu0 %v269_v3  ;;  %v119_v12 = vpack.c.bf16 %v112_v11, %v111_v10  ;;  %v114_v14 = vld [vmem:[%s374_s3 + $0x18] sm:$0xff]  ;;  %v115_v16 = vld [vmem:[%s374_s3 + $0x20] sm:$0xff]  ;;  %v116_v17 = vld [vmem:[%s374_s3 + $0x28] sm:$0xff]  ;;  %s245_s23 = scalar_lea.vmem %s194_s22, 256  ;;  %p250_p1 = scmp.lt.s32.totalorder %s194_s22, %s194_s22 }
   0x6   :  { %v120_v15 = vpack.c.bf16 %v114_v14, %v113_v13  ;;  %v121_v18 = vpack.c.bf16 %v116_v17, %v115_v16  ;;  %v117_v19 = vld [vmem:[%s374_s3 + $0x30] sm:$0xff]  ;;  %v118_v20 = vld [vmem:[%s374_s3 + $0x38] sm:$0xff]  ;;  %v204_v22 = vld [vmem:[%s373_s2] ss:$0 sm:$0xff]  ;;  %p246_p0 = scmp.ne.s32.totalorder %s194_s22, %s245_s23  ;;  %p251_p2 = scmp.lt.s32.totalorder %s245_s23, %s245_s23 }
   0x7   :  { %225 = vmatpush3.bf16.msra.mxu1 %v119_v12  ;;  %v122_v21 = vpack.c.bf16 %v118_v20, %v117_v19  ;;  %v207_v56 = vld [vmem:[%s375_s4] ss:$0 sm:$0xff] }
   0x8   :  { %219 = vmatpush3.bf16.msra.mxu0 %v37_v6  ;;  %226 = vmatprep.subr.bf16.mxu1 %v269_v3  ;;  %v108_v48 = vld [vmem:[#allocation2] sm:$0xff]  ;;  %p252_p3 = por %p251_p2, %p250_p1 }
   0x9   :  { %v109_v50 = vld [vmem:[#allocation2 + $0x8] sm:$0xff] }
   0xa   :  { %p253_p4 = pnand %p252_p3, %p246_p0 }
   0xb   :  { %221 = vmatmul.mubr.msk.bf16.vlgmr.msra.gmra.mrb[0].mxu0 %vm26_vm0, %v31_v9  ;;  %227 = vmatpush3.bf16.msra.mxu1 %v120_v15 }
   0xc   :  { %228 = vmatprep.subr.bf16.mxu1 %v269_v3 }
   0xf   :  { %229 = vmatpush3.bf16.msra.mxu1 %v121_v18 }
  0x10   :  { %230 = vmatprep.subr.bf16.mxu1 %v269_v3 }
  0x13   :  { %231 = vmatpush3.bf16.msra.mxu1 %v122_v21 }
  0xde   :  { %v83_v23 = vpop.f32.mrb[0].mxu0 }
  0xdf   :  { %v84_v24 = vadd.f32 %v204_v22, %v83_v23  ;;  %v222_v25 = vpop.f32.mrb[1].mxu0 }
  0xe0   :  { %v86_v26 = vpop.f32.mrb[2].mxu0 }
  0xe1   :  { %v92_v27 = vmul.f32 %v84_v24, %v84_v24  ;;  %v87_v28 = vadd.f32 %v204_v22, %v86_v26  ;;  %v223_v29 = vpop.f32.mrb[3].mxu0  ;;  %v90_v42 = vmul.f32 0.5, %v84_v24 }
  0xe3   :  { %v94_v30 = vmul.f32 %v92_v27, %v84_v24  ;;  %v93_v31 = vmul.f32 %v87_v28, %v87_v28  ;;  %v91_v43 = vmul.f32 0.5, %v87_v28 }
  0xe5   :  { %v96_v32 = vmul.f32 0.044715, %v94_v30  ;;  %v95_v33 = vmul.f32 %v93_v31, %v87_v28 }
  0xe7   :  { %v98_v34 = vadd.f32 %v96_v32, %v84_v24  ;;  %v97_v35 = vmul.f32 0.044715, %v95_v33 }
  0xe9   :  { %v100_v36 = vmul.f32 0.7978846, %v98_v34  ;;  %v99_v37 = vadd.f32 %v97_v35, %v87_v28 }
  0xeb   :  { %241 = vtanh.f32 %v100_v36  ;;  %v101_v38 = vmul.f32 0.7978846, %v99_v37 }
  0xed   :  { %243 = vtanh.f32 %v101_v38 }
  0xf5   :  { %v242_v39 = vpop.eup %241 }
  0xf6   :  { %v104_v40 = vadd.f32 1.0, %v242_v39 }
  0xf7   :  { %v244_v41 = vpop.eup %243 }
  0xf8   :  { %v105_v44 = vadd.f32 1.0, %v244_v41  ;;  %v106_v45 = vmul.f32 %v104_v40, %v90_v42 }
  0xfa   :  { %v107_v46 = vmul.f32 %v105_v44, %v91_v43 }
  0xfc   :  { %v110_v47 = vpack.c.bf16 %v107_v46, %v106_v45 }
  0xfe   :  { %233 = vmatmul.mubr.msk.bf16.vlgmr.msra.gmra.mrb[0].mxu1 %vm123_vm2, %v110_v47 }
 0x1d1   :  { %v161_v49 = vpop.f32.mrb[0].mxu1 }
 0x1d2   :  { %v168_v51 = vadd.f32 %v161_v49, %v108_v48  ;;  %v234_v52 = vpop.f32.mrb[1].mxu1 }
 0x1d3   :  { %v164_v53 = vpop.f32.mrb[2].mxu1 }
 0x1d4   :  { %170 = vst.msk [vmem:[#allocation2] sm:$0xff] %vm26_vm0, %v168_v51  ;;  %v169_v54 = vadd.f32 %v164_v53, %v109_v50  ;;  %v235_v55 = vpop.f32.mrb[3].mxu1 }
 0x1d6   :  { %171 = vst.msk [vmem:[#allocation2 + $0x8] sm:$0xff] %vm26_vm0, %v169_v54 }
 0x1db   :  { %v175_v57 = vld [vmem:[#allocation2] sm:$0xff] }
 0x1dc   :  { %v184_v58 = vadd.f32 %v207_v56, %v175_v57 }
 0x1dd   :  { %v176_v59 = vld [vmem:[#allocation2 + $0x8] sm:$0xff] }
 0x1de   :  { %v185_v60 = vadd.f32 %v207_v56, %v176_v59  ;;  %186 = vst.msk [vmem:[#allocation2] sm:$0xff] %vm26_vm0, %v184_v58 }
 0x1e0   :  { %187 = vst.msk [vmem:[#allocation2 + $0x8] sm:$0xff] %vm26_vm0, %v185_v60 }
 0x1e1   :  { %256 = shalt.err (!%p253_p4)
}
 0x1e2   :  { %s257_s25 = scalar_lea.hbm %s376_s5, 256 }
 0x1e3   :  { %p258_p5 = scmp.ne.s32.totalorder %s376_s5, %s257_s25  ;;  %p261_p6 = scmp.lt.u32.totalorder %s257_s25, %s376_s5 }
 0x1e5   :  { %p263_p7 = pnand %p261_p6, %p258_p5 }
 0x1e7   :  { %266 = shalt.err (!%p263_p7)
}
 0x1e8   :  { %s272_s1 = smov 128   ;;  %s273_s30 = smov 8  }
 0x1e9   :  { %199 = dma.vmem_to_hbm [thread:$0]  %s194_s22, 256, %s376_s5, [#allocation3], %s272_s1, %s272_s1, %s273_s30  }
 0x1ea   :  { %267 = dma.done.wait [#allocation3], 256  }
 0x1eb   :  { %268 = vsyncadd [#allocation3], 4294967040 }
 0x1ec   :  { %203 = vsyncpa [#allocation3], 1 }

</bundles_post_ra>
